<compile_context>
chip_gen: v5e
topology: v5e:2x2
jax: 0.10.0
libtpu: 0.0.40
codegen_flags: <defaults>
</compile_context>

<pallas_src>
import functools

import jax
import jax.numpy as jnp
from jax import lax
from jax.experimental import pallas as pl
from jax.experimental.pallas import tpu as pltpu


def _conv_block_kernel(x_ref, w0_ref, b0_ref, w1_ref, b1_ref, o_ref, *, K):
    """Fused ConvBlock: relu(x + conv1(relu(conv0(x)))) for a (Bt, L, D) batch tile.

    x_ref : (Bt, L, D)   input tile (f32)
    w*_ref: (K, D, D)    merged conv weights (tap, d_in, d_out), compute dtype
    b*_ref: (1, D)       merged bias (f32)
    o_ref : (Bt, L, D)   output tile
    """
    Bt, L, D = o_ref.shape
    P = (K - 1) // 2

    # Row-index grid, hoisted once and reused by both layers' masks.
    row = lax.broadcasted_iota(jnp.int32, (Bt, L, D), 1)

    def conv_layer(act, w_ref, b_ref):
        # act: (Bt, L, D) f32 activations ("same" zero padding handled via roll + mask).
        acc = b_ref[...].astype(jnp.float32)                 # (1, D), broadcasts over rows
        for k in range(K):                                    # static unroll over taps
            d = k - P                                         # tap offset along sequence
            if d == 0:
                tap = act
            else:
                # tap[:, l, :] = act[:, l + d, :] if 0 <= l + d < L else 0
                shifted = pltpu.roll(act, shift=(-d) % L, axis=1)   # XLU sublane rotate
                if d > 0:
                    tap = jnp.where(row < (L - d), shifted, 0.0)
                else:
                    tap = jnp.where(row >= (-d), shifted, 0.0)
            # (Bt, L) merge is a pure relabeling (L % 8 == 0); bf16 operands, f32 acc.
            acc = acc + jnp.dot(tap.reshape(Bt * L, D).astype(w_ref.dtype),
                                w_ref[k],
                                preferred_element_type=jnp.float32)
        return acc.reshape(Bt, L, D)
        # TODO(synk): benchmark folding the K taps into one (rows, K*D) @ (K*D, D)
        # contraction (deeper MXU occupancy) vs. the minor-dim concat relayout cost.

    # layer 0: h = relu(conv0(x))
    h = jnp.maximum(conv_layer(x_ref[...].astype(jnp.float32), w0_ref, b0_ref), 0.0)
    # layer 1 + residual + relu; x is re-read here instead of held live across layer 1.
    y = conv_layer(h, w1_ref, b1_ref)
    o_ref[...] = jnp.maximum(x_ref[...].astype(jnp.float32) + y, 0.0).astype(o_ref.dtype)
    # TODO(synk): lane-dense output repacking ((Bt,L,D)->(Bt,L*D)) to avoid 16-lane
    # masked stores; needs a measured check that the sublane->lane repack is cheaper.


def conv_block_pallas(x, params0, params1, *, block_rows=32768,
                      compute_dtype=jnp.bfloat16):
    """Fused ConvBlock via one pallas_call.

    x: (B, L, D) float32; params = (W: (K, D, D), b: (D,)) per layer.
    compute_dtype: MXU operand dtype (bf16 default; accumulation is always f32).
    """
    W0, b0 = params0
    W1, b1 = params1
    B, L, D = x.shape
    K = W0.shape[0]
    assert W1.shape[0] == K and K % 2 == 1
    # TODO(synk): support L % 8 != 0 (wrapper-side pad + in-kernel row masking) and tile
    # L with an 8-aligned (K-1)-row halo for long sequences / tiny B (v7x 64 MiB VMEM,
    # >= 2 grid steps for its 2 TensorCores).
    assert L % 8 == 0, "sequence length must be a multiple of 8"

    # ---- tile sizing: big batch tiles under a generation-aware VMEM budget ----
    try:
        vmem_cap = int(getattr(pltpu.get_tpu_info(), "vmem_capacity_bytes",
                               64 * 1024 * 1024))
    except Exception:
        vmem_cap = 64 * 1024 * 1024                       # conservative (v7x per-TC)
    itemsize = 4                                          # f32 tiles / temporaries
    # Per-step working set ~ 8x tile bytes (2x double-buffered input, 2x output,
    # act/h/tap/acc temporaries).  Keep it well inside physical VMEM on every gen.
    work_budget = min(vmem_cap // 2, 32 * 1024 * 1024)
    max_rows = max(L, work_budget // (8 * D * itemsize))
    rows = min(block_rows, max_rows)                      # target MXU rows per step
    Bt = max(1, min(B, rows // L))
    if B >= 2 and pl.cdiv(B, Bt) < 2:
        Bt = pl.cdiv(B, 2)                                # >= 2 steps: both v7x TCs work
    grid = (pl.cdiv(B, Bt),)                              # ragged tail rows are dropped
    tile_bytes = Bt * L * D * itemsize
    vmem_limit = int(min(vmem_cap, max(32 * 1024 * 1024, 12 * tile_bytes)))

    kernel = functools.partial(_conv_block_kernel, K=K)
    args = (x,
            W0.astype(compute_dtype), b0.reshape(1, D).astype(jnp.float32),
            W1.astype(compute_dtype), b1.reshape(1, D).astype(jnp.float32))

    return pl.pallas_call(
        kernel,
        out_shape=jax.ShapeDtypeStruct((B, L, D), x.dtype),
        grid=grid,
        in_specs=[
            pl.BlockSpec((Bt, L, D), lambda i: (i, 0, 0)),   # x   (batch tiled)
            pl.BlockSpec((K, D, D), lambda i: (0, 0, 0)),    # W0  (resident)
            pl.BlockSpec((1, D), lambda i: (0, 0)),          # b0  (resident)
            pl.BlockSpec((K, D, D), lambda i: (0, 0, 0)),    # W1  (resident)
            pl.BlockSpec((1, D), lambda i: (0, 0)),          # b1  (resident)
        ],
        out_specs=pl.BlockSpec((Bt, L, D), lambda i: (i, 0, 0)),
        compiler_params=pltpu.CompilerParams(
            dimension_semantics=("parallel",),
            vmem_limit_bytes=vmem_limit),
    )(*args)


def make_conv_layer_params(key, filter_mapping, input_dim):
    """Merged (K, D, D) weights + (D,) bias from per-filter-size Conv2d params.

    Mirrors nn.Conv2d(1, nf, (fs, D)) weights (nf, 1, fs, D); smaller filters are
    zero-padded to the max filter size with centers aligned.
    """
    D = input_dim
    K = max(filter_mapping.keys())
    W = jnp.zeros((K, D, D), jnp.float32)
    bias = jnp.zeros((D,), jnp.float32)
    off = 0
    for fs, nf in filter_mapping.items():
        key, kw, kb = jax.random.split(key, 3)
        w_fs = jax.random.normal(kw, (nf, fs, D), jnp.float32) * 0.1
        b_fs = jax.random.normal(kb, (nf,), jnp.float32) * 0.1
        start = (K - fs) // 2
        W = W.at[start:start + fs, :, off:off + nf].set(jnp.transpose(w_fs, (1, 2, 0)))
        bias = bias.at[off:off + nf].set(b_fs)
        off += nf
    return W, bias


def _conv_layer_ref(x, W, b, *, operand_dtype=jnp.float32):
    B, L, D = x.shape
    K = W.shape[0]
    P = (K - 1) // 2
    xp = jnp.pad(x.astype(jnp.float32), ((0, 0), (P, P), (0, 0)))
    out = jnp.broadcast_to(b[None, None, :].astype(jnp.float32), (B, L, D))
    Wc = W.astype(operand_dtype)
    for k in range(K):
        tap = xp[:, k:k + L, :].astype(operand_dtype)
        out = out + jnp.einsum('bld,de->ble', tap, Wc[k],
                               preferred_element_type=jnp.float32)
    return out


def conv_block_ref(x, params0, params1, *, operand_dtype=jnp.float32):
    W0, b0 = params0
    W1, b1 = params1
    h = jax.nn.relu(_conv_layer_ref(x, W0, b0, operand_dtype=operand_dtype))
    return jax.nn.relu(x + _conv_layer_ref(h, W1, b1, operand_dtype=operand_dtype))


if __name__ == "__main__":
    # filter_mapping: odd filter sizes -> num filters; input_dim = sum of values.
    filter_mapping = {1: 4, 3: 8, 5: 4}
    D = sum(filter_mapping.values())          # 16
    B, L = 2, 16

    key = jax.random.PRNGKey(0)
    kx, k0, k1 = jax.random.split(key, 3)
    x = jax.random.normal(kx, (B, L, D), jnp.float32)
    params0 = make_conv_layer_params(k0, filter_mapping, D)
    params1 = make_conv_layer_params(k1, filter_mapping, D)

    # Default kernel: bf16 MXU operands, f32 accumulation / bias / residual / ReLU.
    out = jax.block_until_ready(conv_block_pallas(x, params0, params1))
    assert out.shape == (B, L, D)
    ref_bf16 = conv_block_ref(x, params0, params1, operand_dtype=jnp.bfloat16)
    ref_f32 = conv_block_ref(x, params0, params1)
    assert jnp.allclose(out, ref_bf16, atol=1e-3, rtol=1e-3), "mismatch vs bf16-matched ref"
    assert jnp.allclose(out, ref_f32, atol=5e-2, rtol=5e-2), "mismatch vs f32 ref"

    # Full-f32 variant: tight structural check against the exact reference.
    out_f32 = jax.block_until_ready(
        conv_block_pallas(x, params0, params1, compute_dtype=jnp.float32))
    assert jnp.allclose(out_f32, ref_f32, atol=5e-4, rtol=5e-4), "mismatch vs f32 ref (f32 kernel)"

    print("KERNEL_OK")
</pallas_src>

<mosaic_0001>
module attributes {stable_mosaic.version = 11 : i64} {
  func.func @_conv_block_kernel(%arg0: i32, %arg1: memref<1x16x16xf32, #tpu.memory_space<vmem>>, %arg2: memref<5x16x16xbf16, #tpu.memory_space<vmem>>, %arg3: memref<1x16xf32, #tpu.memory_space<vmem>>, %arg4: memref<5x16x16xbf16, #tpu.memory_space<vmem>>, %arg5: memref<1x16xf32, #tpu.memory_space<vmem>>, %arg6: memref<1x16x16xf32, #tpu.memory_space<vmem>>) attributes {dimension_semantics = [#tpu.dimension_semantics<parallel>], iteration_bounds = array<i64: 2>, scalar_prefetch = 0 : i64, scratch_operands = 0 : i64, tpu.core_type = #tpu.core_type<tc>, window_params = [{transform_indices = @transform_0, window_bounds = array<i64: 1, 16, 16>}, {pipeline_mode = #tpu.pipeline_mode<synchronous>, transform_indices = @transform_1, window_bounds = array<i64: 5, 16, 16>}, {pipeline_mode = #tpu.pipeline_mode<synchronous>, transform_indices = @transform_2, window_bounds = array<i64: 1, 16>}, {pipeline_mode = #tpu.pipeline_mode<synchronous>, transform_indices = @transform_3, window_bounds = array<i64: 5, 16, 16>}, {pipeline_mode = #tpu.pipeline_mode<synchronous>, transform_indices = @transform_4, window_bounds = array<i64: 1, 16>}, {transform_indices = @transform_5, window_bounds = array<i64: 1, 16, 16>}]} {
    %0 = tpu.iota {dimensions = array<i32: 1>} : vector<1x16x16xi32>
    %c0 = arith.constant 0 : index
    %c0_0 = arith.constant 0 : index
    %c0_1 = arith.constant 0 : index
    %1 = vector.load %arg1[%c0, %c0_0, %c0_1] : memref<1x16x16xf32, #tpu.memory_space<vmem>>, vector<1x16x16xf32>
    %c0_2 = arith.constant 0 : index
    %c0_3 = arith.constant 0 : index
    %2 = vector.load %arg3[%c0_2, %c0_3] : memref<1x16xf32, #tpu.memory_space<vmem>>, vector<1x16xf32>
    %c2_i32 = arith.constant 2 : i32
    %3 = tpu.dynamic_rotate %1 by %c2_i32 dim 1 : vector<1x16x16xf32>, i32 -> vector<1x16x16xf32>
    %c2_i32_4 = arith.constant 2 : i32
    %4 = vector.broadcast %c2_i32_4 : i32 to vector<1x16x16xi32>
    %5 = arith.cmpi sge, %0, %4 : vector<1x16x16xi32>
    %cst = arith.constant 0.000000e+00 : f32
    %6 = vector.broadcast %cst : f32 to vector<1x16x16xf32>
    %7 = arith.select %5, %3, %6 : vector<1x16x16xi1>, vector<1x16x16xf32>
    %8 = vector.shape_cast %7 : vector<1x16x16xf32> to vector<16x16xf32>
    %9 = arith.truncf %8 : vector<16x16xf32> to vector<16x16xbf16>
    %c0_5 = arith.constant 0 : index
    %c0_6 = arith.constant 0 : index
    %c0_7 = arith.constant 0 : index
    %10 = vector.load %arg2[%c0_5, %c0_6, %c0_7] : memref<5x16x16xbf16, #tpu.memory_space<vmem>>, vector<1x16x16xbf16>
    %11 = vector.shape_cast %10 : vector<1x16x16xbf16> to vector<16x16xbf16>
    %cst_8 = arith.constant dense<0.000000e+00> : vector<16x16xf32>
    %12 = tpu.matmul %9, %11, %cst_8 {dimension_numbers = #tpu.dot_dimension_numbers<[1], [0], [0], [1], [0, 0, 1, 1], [], []>} : vector<16x16xbf16>, vector<16x16xbf16>, vector<16x16xf32> -> vector<16x16xf32>
    %13 = vector.broadcast %2 : vector<1x16xf32> to vector<16x16xf32>
    %14 = arith.addf %13, %12 : vector<16x16xf32>
    %c1_i32 = arith.constant 1 : i32
    %15 = tpu.dynamic_rotate %1 by %c1_i32 dim 1 : vector<1x16x16xf32>, i32 -> vector<1x16x16xf32>
    %c1_i32_9 = arith.constant 1 : i32
    %16 = vector.broadcast %c1_i32_9 : i32 to vector<1x16x16xi32>
    %17 = arith.cmpi sge, %0, %16 : vector<1x16x16xi32>
    %cst_10 = arith.constant 0.000000e+00 : f32
    %18 = vector.broadcast %cst_10 : f32 to vector<1x16x16xf32>
    %19 = arith.select %17, %15, %18 : vector<1x16x16xi1>, vector<1x16x16xf32>
    %20 = vector.shape_cast %19 : vector<1x16x16xf32> to vector<16x16xf32>
    %21 = arith.truncf %20 : vector<16x16xf32> to vector<16x16xbf16>
    %c1 = arith.constant 1 : index
    %c0_11 = arith.constant 0 : index
    %c0_12 = arith.constant 0 : index
    %22 = vector.load %arg2[%c1, %c0_11, %c0_12] : memref<5x16x16xbf16, #tpu.memory_space<vmem>>, vector<1x16x16xbf16>
    %23 = vector.shape_cast %22 : vector<1x16x16xbf16> to vector<16x16xbf16>
    %cst_13 = arith.constant dense<0.000000e+00> : vector<16x16xf32>
    %24 = tpu.matmul %21, %23, %cst_13 {dimension_numbers = #tpu.dot_dimension_numbers<[1], [0], [0], [1], [0, 0, 1, 1], [], []>} : vector<16x16xbf16>, vector<16x16xbf16>, vector<16x16xf32> -> vector<16x16xf32>
    %25 = arith.addf %14, %24 : vector<16x16xf32>
    %26 = vector.shape_cast %1 : vector<1x16x16xf32> to vector<16x16xf32>
    %27 = arith.truncf %26 : vector<16x16xf32> to vector<16x16xbf16>
    %c2 = arith.constant 2 : index
    %c0_14 = arith.constant 0 : index
    %c0_15 = arith.constant 0 : index
    %28 = vector.load %arg2[%c2, %c0_14, %c0_15] : memref<5x16x16xbf16, #tpu.memory_space<vmem>>, vector<1x16x16xbf16>
    %29 = vector.shape_cast %28 : vector<1x16x16xbf16> to vector<16x16xbf16>
    %cst_16 = arith.constant dense<0.000000e+00> : vector<16x16xf32>
    %30 = tpu.matmul %27, %29, %cst_16 {dimension_numbers = #tpu.dot_dimension_numbers<[1], [0], [0], [1], [0, 0, 1, 1], [], []>} : vector<16x16xbf16>, vector<16x16xbf16>, vector<16x16xf32> -> vector<16x16xf32>
    %31 = arith.addf %25, %30 : vector<16x16xf32>
    %c15_i32 = arith.constant 15 : i32
    %32 = tpu.dynamic_rotate %1 by %c15_i32 dim 1 : vector<1x16x16xf32>, i32 -> vector<1x16x16xf32>
    %c15_i32_17 = arith.constant 15 : i32
    %33 = vector.broadcast %c15_i32_17 : i32 to vector<1x16x16xi32>
    %34 = arith.cmpi slt, %0, %33 : vector<1x16x16xi32>
    %cst_18 = arith.constant 0.000000e+00 : f32
    %35 = vector.broadcast %cst_18 : f32 to vector<1x16x16xf32>
    %36 = arith.select %34, %32, %35 : vector<1x16x16xi1>, vector<1x16x16xf32>
    %37 = vector.shape_cast %36 : vector<1x16x16xf32> to vector<16x16xf32>
    %38 = arith.truncf %37 : vector<16x16xf32> to vector<16x16xbf16>
    %c3 = arith.constant 3 : index
    %c0_19 = arith.constant 0 : index
    %c0_20 = arith.constant 0 : index
    %39 = vector.load %arg2[%c3, %c0_19, %c0_20] : memref<5x16x16xbf16, #tpu.memory_space<vmem>>, vector<1x16x16xbf16>
    %40 = vector.shape_cast %39 : vector<1x16x16xbf16> to vector<16x16xbf16>
    %cst_21 = arith.constant dense<0.000000e+00> : vector<16x16xf32>
    %41 = tpu.matmul %38, %40, %cst_21 {dimension_numbers = #tpu.dot_dimension_numbers<[1], [0], [0], [1], [0, 0, 1, 1], [], []>} : vector<16x16xbf16>, vector<16x16xbf16>, vector<16x16xf32> -> vector<16x16xf32>
    %42 = arith.addf %31, %41 : vector<16x16xf32>
    %c14_i32 = arith.constant 14 : i32
    %43 = tpu.dynamic_rotate %1 by %c14_i32 dim 1 : vector<1x16x16xf32>, i32 -> vector<1x16x16xf32>
    %c14_i32_22 = arith.constant 14 : i32
    %44 = vector.broadcast %c14_i32_22 : i32 to vector<1x16x16xi32>
    %45 = arith.cmpi slt, %0, %44 : vector<1x16x16xi32>
    %cst_23 = arith.constant 0.000000e+00 : f32
    %46 = vector.broadcast %cst_23 : f32 to vector<1x16x16xf32>
    %47 = arith.select %45, %43, %46 : vector<1x16x16xi1>, vector<1x16x16xf32>
    %48 = vector.shape_cast %47 : vector<1x16x16xf32> to vector<16x16xf32>
    %49 = arith.truncf %48 : vector<16x16xf32> to vector<16x16xbf16>
    %c4 = arith.constant 4 : index
    %c0_24 = arith.constant 0 : index
    %c0_25 = arith.constant 0 : index
    %50 = vector.load %arg2[%c4, %c0_24, %c0_25] : memref<5x16x16xbf16, #tpu.memory_space<vmem>>, vector<1x16x16xbf16>
    %51 = vector.shape_cast %50 : vector<1x16x16xbf16> to vector<16x16xbf16>
    %cst_26 = arith.constant dense<0.000000e+00> : vector<16x16xf32>
    %52 = tpu.matmul %49, %51, %cst_26 {dimension_numbers = #tpu.dot_dimension_numbers<[1], [0], [0], [1], [0, 0, 1, 1], [], []>} : vector<16x16xbf16>, vector<16x16xbf16>, vector<16x16xf32> -> vector<16x16xf32>
    %53 = arith.addf %42, %52 : vector<16x16xf32>
    %54 = vector.shape_cast %53 : vector<16x16xf32> to vector<1x16x16xf32>
    %cst_27 = arith.constant 0.000000e+00 : f32
    %55 = vector.broadcast %cst_27 : f32 to vector<1x16x16xf32>
    %56 = arith.maximumf %54, %55 : vector<1x16x16xf32>
    %c0_28 = arith.constant 0 : index
    %c0_29 = arith.constant 0 : index
    %57 = vector.load %arg5[%c0_28, %c0_29] : memref<1x16xf32, #tpu.memory_space<vmem>>, vector<1x16xf32>
    %c2_i32_30 = arith.constant 2 : i32
    %58 = tpu.dynamic_rotate %56 by %c2_i32_30 dim 1 : vector<1x16x16xf32>, i32 -> vector<1x16x16xf32>
    %c2_i32_31 = arith.constant 2 : i32
    %59 = vector.broadcast %c2_i32_31 : i32 to vector<1x16x16xi32>
    %60 = arith.cmpi sge, %0, %59 : vector<1x16x16xi32>
    %cst_32 = arith.constant 0.000000e+00 : f32
    %61 = vector.broadcast %cst_32 : f32 to vector<1x16x16xf32>
    %62 = arith.select %60, %58, %61 : vector<1x16x16xi1>, vector<1x16x16xf32>
    %63 = vector.shape_cast %62 : vector<1x16x16xf32> to vector<16x16xf32>
    %64 = arith.truncf %63 : vector<16x16xf32> to vector<16x16xbf16>
    %c0_33 = arith.constant 0 : index
    %c0_34 = arith.constant 0 : index
    %c0_35 = arith.constant 0 : index
    %65 = vector.load %arg4[%c0_33, %c0_34, %c0_35] : memref<5x16x16xbf16, #tpu.memory_space<vmem>>, vector<1x16x16xbf16>
    %66 = vector.shape_cast %65 : vector<1x16x16xbf16> to vector<16x16xbf16>
    %cst_36 = arith.constant dense<0.000000e+00> : vector<16x16xf32>
    %67 = tpu.matmul %64, %66, %cst_36 {dimension_numbers = #tpu.dot_dimension_numbers<[1], [0], [0], [1], [0, 0, 1, 1], [], []>} : vector<16x16xbf16>, vector<16x16xbf16>, vector<16x16xf32> -> vector<16x16xf32>
    %68 = vector.broadcast %57 : vector<1x16xf32> to vector<16x16xf32>
    %69 = arith.addf %68, %67 : vector<16x16xf32>
    %c1_i32_37 = arith.constant 1 : i32
    %70 = tpu.dynamic_rotate %56 by %c1_i32_37 dim 1 : vector<1x16x16xf32>, i32 -> vector<1x16x16xf32>
    %c1_i32_38 = arith.constant 1 : i32
    %71 = vector.broadcast %c1_i32_38 : i32 to vector<1x16x16xi32>
    %72 = arith.cmpi sge, %0, %71 : vector<1x16x16xi32>
    %cst_39 = arith.constant 0.000000e+00 : f32
    %73 = vector.broadcast %cst_39 : f32 to vector<1x16x16xf32>
    %74 = arith.select %72, %70, %73 : vector<1x16x16xi1>, vector<1x16x16xf32>
    %75 = vector.shape_cast %74 : vector<1x16x16xf32> to vector<16x16xf32>
    %76 = arith.truncf %75 : vector<16x16xf32> to vector<16x16xbf16>
    %c1_40 = arith.constant 1 : index
    %c0_41 = arith.constant 0 : index
    %c0_42 = arith.constant 0 : index
    %77 = vector.load %arg4[%c1_40, %c0_41, %c0_42] : memref<5x16x16xbf16, #tpu.memory_space<vmem>>, vector<1x16x16xbf16>
    %78 = vector.shape_cast %77 : vector<1x16x16xbf16> to vector<16x16xbf16>
    %cst_43 = arith.constant dense<0.000000e+00> : vector<16x16xf32>
    %79 = tpu.matmul %76, %78, %cst_43 {dimension_numbers = #tpu.dot_dimension_numbers<[1], [0], [0], [1], [0, 0, 1, 1], [], []>} : vector<16x16xbf16>, vector<16x16xbf16>, vector<16x16xf32> -> vector<16x16xf32>
    %80 = arith.addf %69, %79 : vector<16x16xf32>
    %81 = vector.shape_cast %56 : vector<1x16x16xf32> to vector<16x16xf32>
    %82 = arith.truncf %81 : vector<16x16xf32> to vector<16x16xbf16>
    %c2_44 = arith.constant 2 : index
    %c0_45 = arith.constant 0 : index
    %c0_46 = arith.constant 0 : index
    %83 = vector.load %arg4[%c2_44, %c0_45, %c0_46] : memref<5x16x16xbf16, #tpu.memory_space<vmem>>, vector<1x16x16xbf16>
    %84 = vector.shape_cast %83 : vector<1x16x16xbf16> to vector<16x16xbf16>
    %cst_47 = arith.constant dense<0.000000e+00> : vector<16x16xf32>
    %85 = tpu.matmul %82, %84, %cst_47 {dimension_numbers = #tpu.dot_dimension_numbers<[1], [0], [0], [1], [0, 0, 1, 1], [], []>} : vector<16x16xbf16>, vector<16x16xbf16>, vector<16x16xf32> -> vector<16x16xf32>
    %86 = arith.addf %80, %85 : vector<16x16xf32>
    %c15_i32_48 = arith.constant 15 : i32
    %87 = tpu.dynamic_rotate %56 by %c15_i32_48 dim 1 : vector<1x16x16xf32>, i32 -> vector<1x16x16xf32>
    %c15_i32_49 = arith.constant 15 : i32
    %88 = vector.broadcast %c15_i32_49 : i32 to vector<1x16x16xi32>
    %89 = arith.cmpi slt, %0, %88 : vector<1x16x16xi32>
    %cst_50 = arith.constant 0.000000e+00 : f32
    %90 = vector.broadcast %cst_50 : f32 to vector<1x16x16xf32>
    %91 = arith.select %89, %87, %90 : vector<1x16x16xi1>, vector<1x16x16xf32>
    %92 = vector.shape_cast %91 : vector<1x16x16xf32> to vector<16x16xf32>
    %93 = arith.truncf %92 : vector<16x16xf32> to vector<16x16xbf16>
    %c3_51 = arith.constant 3 : index
    %c0_52 = arith.constant 0 : index
    %c0_53 = arith.constant 0 : index
    %94 = vector.load %arg4[%c3_51, %c0_52, %c0_53] : memref<5x16x16xbf16, #tpu.memory_space<vmem>>, vector<1x16x16xbf16>
    %95 = vector.shape_cast %94 : vector<1x16x16xbf16> to vector<16x16xbf16>
    %cst_54 = arith.constant dense<0.000000e+00> : vector<16x16xf32>
    %96 = tpu.matmul %93, %95, %cst_54 {dimension_numbers = #tpu.dot_dimension_numbers<[1], [0], [0], [1], [0, 0, 1, 1], [], []>} : vector<16x16xbf16>, vector<16x16xbf16>, vector<16x16xf32> -> vector<16x16xf32>
    %97 = arith.addf %86, %96 : vector<16x16xf32>
    %c14_i32_55 = arith.constant 14 : i32
    %98 = tpu.dynamic_rotate %56 by %c14_i32_55 dim 1 : vector<1x16x16xf32>, i32 -> vector<1x16x16xf32>
    %c14_i32_56 = arith.constant 14 : i32
    %99 = vector.broadcast %c14_i32_56 : i32 to vector<1x16x16xi32>
    %100 = arith.cmpi slt, %0, %99 : vector<1x16x16xi32>
    %cst_57 = arith.constant 0.000000e+00 : f32
    %101 = vector.broadcast %cst_57 : f32 to vector<1x16x16xf32>
    %102 = arith.select %100, %98, %101 : vector<1x16x16xi1>, vector<1x16x16xf32>
    %103 = vector.shape_cast %102 : vector<1x16x16xf32> to vector<16x16xf32>
    %104 = arith.truncf %103 : vector<16x16xf32> to vector<16x16xbf16>
    %c4_58 = arith.constant 4 : index
    %c0_59 = arith.constant 0 : index
    %c0_60 = arith.constant 0 : index
    %105 = vector.load %arg4[%c4_58, %c0_59, %c0_60] : memref<5x16x16xbf16, #tpu.memory_space<vmem>>, vector<1x16x16xbf16>
    %106 = vector.shape_cast %105 : vector<1x16x16xbf16> to vector<16x16xbf16>
    %cst_61 = arith.constant dense<0.000000e+00> : vector<16x16xf32>
    %107 = tpu.matmul %104, %106, %cst_61 {dimension_numbers = #tpu.dot_dimension_numbers<[1], [0], [0], [1], [0, 0, 1, 1], [], []>} : vector<16x16xbf16>, vector<16x16xbf16>, vector<16x16xf32> -> vector<16x16xf32>
    %108 = arith.addf %97, %107 : vector<16x16xf32>
    %109 = vector.shape_cast %108 : vector<16x16xf32> to vector<1x16x16xf32>
    %c0_62 = arith.constant 0 : index
    %c0_63 = arith.constant 0 : index
    %c0_64 = arith.constant 0 : index
    %110 = vector.load %arg1[%c0_62, %c0_63, %c0_64] : memref<1x16x16xf32, #tpu.memory_space<vmem>>, vector<1x16x16xf32>
    %111 = arith.addf %110, %109 : vector<1x16x16xf32>
    %cst_65 = arith.constant 0.000000e+00 : f32
    %112 = vector.broadcast %cst_65 : f32 to vector<1x16x16xf32>
    %113 = arith.maximumf %111, %112 : vector<1x16x16xf32>
    %c0_66 = arith.constant 0 : index
    %c0_67 = arith.constant 0 : index
    %c0_68 = arith.constant 0 : index
    %114 = vector.load %arg6[%c0_66, %c0_67, %c0_68] : memref<1x16x16xf32, #tpu.memory_space<vmem>>, vector<1x16x16xf32>
    tpu.vector_store %arg6[%c0_66, %c0_67, %c0_68], %113 {strides = array<i32>} : memref<1x16x16xf32, #tpu.memory_space<vmem>>, vector<1x16x16xf32>,
    return
  }
  func.func @transform_0(%arg0: i32) -> (i32, i32, i32) {
    %c0_i32 = arith.constant 0 : i32
    %c0_i32_0 = arith.constant 0 : i32
    %c0_i32_1 = arith.constant 0 : i32
    return %arg0, %c0_i32, %c0_i32_0 : i32, i32, i32
  }
  func.func @transform_1(%arg0: i32) -> (i32, i32, i32) {
    %c0_i32 = arith.constant 0 : i32
    %c0_i32_0 = arith.constant 0 : i32
    %c0_i32_1 = arith.constant 0 : i32
    %c0_i32_2 = arith.constant 0 : i32
    return %c0_i32, %c0_i32_0, %c0_i32_1 : i32, i32, i32
  }
  func.func @transform_2(%arg0: i32) -> (i32, i32) {
    %c0_i32 = arith.constant 0 : i32
    %c0_i32_0 = arith.constant 0 : i32
    %c0_i32_1 = arith.constant 0 : i32
    return %c0_i32, %c0_i32_0 : i32, i32
  }
  func.func @transform_3(%arg0: i32) -> (i32, i32, i32) {
    %c0_i32 = arith.constant 0 : i32
    %c0_i32_0 = arith.constant 0 : i32
    %c0_i32_1 = arith.constant 0 : i32
    %c0_i32_2 = arith.constant 0 : i32
    return %c0_i32, %c0_i32_0, %c0_i32_1 : i32, i32, i32
  }
  func.func @transform_4(%arg0: i32) -> (i32, i32) {
    %c0_i32 = arith.constant 0 : i32
    %c0_i32_0 = arith.constant 0 : i32
    %c0_i32_1 = arith.constant 0 : i32
    return %c0_i32, %c0_i32_0 : i32, i32
  }
  func.func @transform_5(%arg0: i32) -> (i32, i32, i32) {
    %c0_i32 = arith.constant 0 : i32
    %c0_i32_0 = arith.constant 0 : i32
    %c0_i32_1 = arith.constant 0 : i32
    return %arg0, %c0_i32, %c0_i32_0 : i32, i32, i32
  }
}

</mosaic_0001>

<bundles_post_ra>
// kernel: tpu_custom_call.1
= control target key start
LH: loop header
LB: loop body
LE: loop exit
PB: predicated region body
PF: predicated region fallthrough
CT: control target
= control target key end

     0   :  { %10 = vsyncpa [#allocation3], 0  ;;  %s1352_s0 = inlined_call_operand.hbm [shape: f32[2,16,16], index: 0, kind: input, shape index: {}]   ;;  %s1353_s1 = inlined_call_operand.hbm [shape: bf16[5,16,16], index: 1, kind: input, shape index: {}]   ;;  %s1354_s2 = inlined_call_operand.vmem [shape: f32[1,16], index: 2, kind: input, shape index: {}]   ;;  %s1355_s3 = inlined_call_operand.hbm [shape: bf16[5,16,16], index: 3, kind: input, shape index: {}]   ;;  %s1356_s4 = inlined_call_operand.vmem [shape: f32[1,16], index: 4, kind: input, shape index: {}]   ;;  %s1357_s5 = inlined_call_operand.hbm [shape: f32[2,16,16], index: 5, kind: output, shape index: {}]  }
   0x1   :  { %12 = vsyncpa [#allocation3 + $0x1], 0 }
   0x2   :  { %13 = vsyncpa [#allocation6], 0 }
   0x3   :  { %14 = vsyncpa [#allocation4], 0 }
   0x4   :  { %16 = vsyncpa [#allocation4 + $0x1], 0  ;;  %s1112_s18 = smov 0   ;;  %s1114_s19 = smov 0  }
   0x5   :  { %s1116_s20 = smov 0   ;;  %s1118_s21 = smov 0  }
   0x6 LB: > { %s1133_s22 = sadd.s32 4294967295, %s1072_s21   ;;  %s757_s23 = sadd.s32 4294967294, %s1072_s21   ;;  %s1072_s21 = sphi %s1118_s21, %s1367_s21   ;;  %s1068_s20 = sphi %s1116_s20, %s1366_s20   ;;  %s1064_s19 = sphi %s1114_s19, %s1365_s19   ;;  %s1060_s18 = sphi %s1112_s18, %s1364_s18  }
   0x7   : > { %p42_p0 = scmp.ne.s32.totalorder %s1064_s19, %s1060_s18  ;;  %p43_p1 = scmp.eq.s32.totalorder %s1133_s22, 0 }
   0x8   : > { %p150_p2 = scmp.eq.s32.totalorder %s1133_s22, 1  ;;  %p156_p3 = scmp.eq.s32.totalorder %s757_s23, 1 }
   0x9   : > { %p1142_p4 = por %p43_p1, %p42_p0  ;;  %p758_p5 = scmp.ge.s32.totalorder %s1072_s21, 1 }
   0xa   : > { %p1147_p6 = por %p156_p3, %p42_p0  ;;  %p163_p7 = scmp.lt.s32.totalorder %s1072_s21, 3 }
   0xb   : > { %s174_s28 = sshll.u32 %s1353_s1, 4  ;;  %s1074_s30 = smov [#allocation5]   ;;  %s175_s28 = int_to_ptr.hbm [resolvable:$true] %s174_s28 }
   0xc   : > { %p1155_p8 = pnand %p758_p5, %p163_p7  ;;  %s176_s6 = sshll.u32 %s1074_s30, 4  ;;  %s177_s6 = int_to_ptr.vmem [resolvable:$true] %s176_s6 }
   0xd   : > { %s191_s9 = sshll.u32 %s1355_s3, 4  ;;  %s1075_s10 = smov 64   ;;  %s192_s9 = int_to_ptr.hbm [resolvable:$true] %s191_s9 }
   0xe   : > { %p849_p9 = pneg %p1155_p8  ;;  %s1076_s11 = smov 4  }
   0xf   : > { %s1077_s12 = smov [#allocation7]   ;;  %s1168_s14 = sadd.s32 1, %s1072_s21  }
  0x10   : > { %p850_p10 = pnand %p849_p9, %p43_p1  ;;  %s193_s13 = sshll.u32 %s1077_s12, 4  ;;  %s194_s13 = int_to_ptr.vmem [resolvable:$true] %s193_s13 }
  0x11   : > { %s29_s15 = sadd.s32 1, %s1068_s20  ;;  %s26_s16 = ssub.s32 %s1072_s21, %s1168_s14 }
  0x12   : > { %852 = dma.hbm_to_vmem [thread:$0]  (!%p850_p10), %s175_s28, 640, %s177_s6, [#allocation6], %s1075_s10, %s1075_s10, %s1076_s11  }
  0x13   : > { %855 = dma.hbm_to_vmem [thread:$0]  (!%p850_p10), %s192_s9, 640, %s194_s13, [#allocation6], %s1075_s10, %s1075_s10, %s1076_s11  }
  0x14   : > { %p36_p12 = scmp.ne.s32.totalorder %s1068_s20, %s1064_s19  ;;  %p27_p13 = scmp.eq.s32.totalorder %s26_s16, 0 }
  0x15   : > { %p37_p0 = scmp.eq.s32.totalorder %s1072_s21, 0  ;;  %p866_p5 = scmp.lt.s32.totalorder %s1072_s21, 2 }
  0x16   : > { %p1178_p3 = por %p150_p2, %p36_p12  ;;  %s210_s26 = sand.u32 1, %s1068_s20  }
  0x17   : > { %s1184_s23 = scalar_select %p27_p13, %s1068_s20, %s29_s15  }
  0x18   : > { %p38_p7 = por %p37_p0, %p36_p12  ;;  %s762_s27 = sshll.u32 %s210_s26, 4 }
  0x19   : > { %s825_s28 = sshll.u32 %s1072_s21, 4  ;;  %s214_s8 = scalar_lea.vmem [#allocation2], %s762_s27 }
  0x1a   : > { %s219_s7 = scalar_lea.hbm %s1352_s0, %s825_s28  ;;  %s222_s9 = sshll.u32 %s214_s8, 4  ;;  %s223_s9 = int_to_ptr.vmem [resolvable:$true] %s222_s9 }
  0x1b   : > { %s220_s10 = sshll.u32 %s219_s7, 4  ;;  %p1191_p2 = pnand %p866_p5, %p38_p7  ;;  %s221_s10 = int_to_ptr.hbm [resolvable:$true] %s220_s10 }
  0x1c   : > { %s211_s12 = scalar_lea.sflag [#allocation3], %s210_s26  ;;  %s972_s13 = sshra.s32 %s221_s10, 4  ;;  %s973_s13 = int_to_ptr.hbm [resolvable:$true] %s972_s13 }
  0x1d   : > { %s974_s15 = scalar_lea.hbm %s973_s13, 16  ;;  %p976_p10 = pneg %p1191_p2 }
  0x1e   : > { %p975_p9 = scmp.ne.s32.totalorder %s973_s13, %s974_s15  ;;  %s979_s28 = scalar_lea.hbm %s1352_s0, 32 }
  0x1f   : > { %p980_p0 = scmp.lt.s32.totalorder %s973_s13, %s1352_s0  ;;  %p981_p5 = scmp.lt.s32.totalorder %s979_s28, %s974_s15 }
  0x20   : > { %p977_p12 = pnand %p976_p10, %p975_p9 }
  0x21   : > { %p982_p7 = por %p981_p5, %p980_p0 }
  0x22   : > { %p978_p13 = pneg %p977_p12 }
  0x24   : > { %p983_p11 = pnand %p982_p7, %p978_p13 }
  0x26   : > { %986 = shalt.err (!%p983_p11)
}
  0x27   : > { %s1078_s26 = smov 128   ;;  %s1079_s7 = smov 8  }
  0x28   : > { %859 = dma.hbm_to_vmem [thread:$0]  (!%p1191_p2), %s221_s10, 256, %s223_s9, %s211_s12, %s1078_s26, %s1078_s26, %s1079_s7  }
  0x29   : > { %234 = sbr.rel (%p1155_p8) target bundleno = 378 (0x17a), region = 40  ;;  %s1208_s8 = sand.u32 (!%p1155_p8), 1, %s1064_s19  }
  0x2a   : > { %s766_s13 = sshll.u32 (!%p1155_p8), %s1208_s8, 4  ;;  %s237_s15 = scalar_lea.sflag (!%p1155_p8), [#allocation3], %s1208_s8 }
  0x2b   : > { %s240_s16 = scalar_lea.vmem (!%p1155_p8), [#allocation2], %s766_s13 }
  0x2e   : > { %1047 = dma.done.wait (%p1142_p4), %s237_s15, 256  }
  0x2f   : > { %1049 = vsyncadd (%p1142_p4), %s237_s15, 4294967040 }
  0x30   : > { %1051 = dma.done.wait (%p43_p1), [#allocation6], 1280  }
  0x31   : > { %1053 = vsyncadd (%p43_p1), [#allocation6], 4294966016  ;;  %v279_v0 = vlaneseq  ;;  %v828_v3 = vld [vmem:[#allocation5 + $0x10] sm:$0xff]  ;;  %v826_v4 = vld [vmem:[#allocation5] sm:$0xff]  ;;  %vm303_vm0 = vcmask 130048   ;;  %s836_s11 = sshll.u32 %s1133_s22, 4 }
  0x32   : > { %v829_v5 = vld [vmem:[#allocation5 + $0x18] sm:$0xff]  ;;  %v827_v6 = vld [vmem:[#allocation5 + $0x8] sm:$0xff]  ;;  %v1228_v7 = vld [vmem:[%s240_s16] sm:$0xff]  ;;  %384 = vmatpush.bf16.msra.mxu2 %v828_v3  ;;  %314 = vmatpush.bf16.msra.mxu0 %v826_v4  ;;  %s661_s28 = scalar_lea.hbm %s1357_s5, %s836_s11  ;;  %s277_s30 = scalar_lea.vmem [#allocation8], %s766_s13 }
  0x33   : > { %v1222_v1 = vshrl.u32 %v279_v0, 7  ;;  %v1230_v8 = vld [vmem:[%s240_s16 + $0x8] sm:$0xff]  ;;  %v285_v10 = vrot.slane %v1228_v7, 6  ;;  %v393_v12 = vrot.slane %v1228_v7, 1  ;;  %v830_v13 = vld [vmem:[#allocation5 + $0x20] sm:$0xff]  ;;  %422 = vmatpush.bf16.msra.mxu3 %v829_v5  ;;  %355 = vmatpush.bf16.msra.mxu1 %v827_v6  ;;  %v326_v15 = vrot.slane %v1228_v7, 7 }
  0x34   : > { %v364_v9 = vpack.c.bf16 %v1230_v8, %v1228_v7  ;;  %v286_v11 = vrot.slane %v1230_v8, 6  ;;  %v394_v14 = vrot.slane %v1230_v8, 1  ;;  %v327_v16 = vrot.slane %v1230_v8, 7  ;;  %v831_v35 = vld [vmem:[#allocation7] sm:$0xff]  ;;  %v832_v36 = vld [vmem:[#allocation7 + $0x8] sm:$0xff]  ;;  %v833_v37 = vld [vmem:[#allocation7 + $0x10] sm:$0xff] }
  0x35   : > { %v1225_v2 = vadd.s32 8, %v1222_v1  ;;  %vm287_vm1 = vcmp.lt.s32.totalorder %v1222_v1, 2  ;;  %vm290_vm2 = vcmp.ge.s32.totalorder %v1222_v1, 2  ;;  %vm395_vm3 = vcmp.lt.s32.totalorder %v1222_v1, 7  ;;  %v834_v38 = vld [vmem:[#allocation7 + $0x18] sm:$0xff]  ;;  %v835_v42 = vld [vmem:[#allocation7 + $0x20] sm:$0xff] }
  0x36   : > { %vm328_vm4 = vcmp.lt.s32.totalorder %v1222_v1, 1  ;;  %v288_v17 = vsel %vm287_vm1, %v285_v10, %v286_v11  ;;  %v289_v18 = vsel %vm287_vm1, %v286_v11, %v285_v10  ;;  %460 = vmatpush.bf16.msrb.mxu0 %v830_v13  ;;  %vm331_vm6 = vcmp.ge.s32.totalorder %v1222_v1, 1  ;;  %784 = vmatmul.msk.bf16.vlgmr.msra.gmra.mxu2 %vm303_vm0, %v364_v9  ;;  %v910_v40 = vld [vmem:[%s1354_s2] ss:$0 sm:$0xff]  ;;  %s662_s6 = sshll.u32 %s277_s30, 4  ;;  %s664_s26 = sshll.u32 %s661_s28, 4  ;;  %s663_s6 = int_to_ptr.vmem [resolvable:$true] %s662_s6  ;;  %s665_s26 = int_to_ptr.hbm [resolvable:$true] %s664_s26 }
  0x37   : > { %vm399_vm5 = vcmp.lt.s32.totalorder %v1225_v2, 15  ;;  %v292_v19 = vsel %vm290_vm2, %v289_v18, 0.0  ;;  %v396_v20 = vsel %vm395_vm3, %v393_v12, %v394_v14  ;;  %v397_v21 = vsel %vm395_vm3, %v394_v14, %v393_v12  ;;  %497 = vmatpush.bf16.msrb.mxu1 %v831_v35  ;;  %535 = vmatpush.bf16.msrb.mxu2 %v832_v36  ;;  %s650_s22 = scalar_lea.sflag [#allocation4], %s1208_s8  ;;  %s1016_s7 = sshra.s32 %s665_s26, 4  ;;  %s1017_s7 = int_to_ptr.hbm [resolvable:$true] %s1016_s7 }
  0x38   : > { %v329_v22 = vsel %vm328_vm4, %v326_v15, %v327_v16  ;;  %v294_v23 = vpack.c.bf16 %v288_v17, %v292_v19  ;;  %v401_v24 = vsel %vm399_vm5, %v397_v21, 0.0  ;;  %v330_v25 = vsel %vm328_vm4, %v327_v16, %v326_v15  ;;  %564 = vmatpush.bf16.msrb.mxu3 %v833_v37  ;;  %s1018_s15 = scalar_lea.hbm %s1017_s7, 16  ;;  %s1022_s24 = scalar_lea.hbm %s1357_s5, 32 }
  0x39   : > { %v402_v26 = vpack.c.bf16 %v401_v24, %v396_v20  ;;  %v333_v27 = vsel %vm331_vm6, %v330_v25, 0.0  ;;  %v431_v29 = vrot.slane %v1228_v7, 2  ;;  %v432_v30 = vrot.slane %v1230_v8, 2  ;;  %p1019_p1 = scmp.ne.s32.totalorder %s1017_s7, %s1018_s15  ;;  %p1023_p11 = scmp.lt.s32.totalorder %s1017_s7, %s1357_s5 }
  0x3a   : > { %774 = vmatmul.msk.bf16.vlgmr.msra.gmra.mxu0 %vm303_vm0, %v294_v23  ;;  %v335_v28 = vpack.c.bf16 %v329_v22, %v333_v27  ;;  %vm433_vm7 = vcmp.lt.s32.totalorder %v1222_v1, 6  ;;  %vm437_vm8 = vcmp.lt.s32.totalorder %v1225_v2, 14  ;;  %p1024_p2 = scmp.lt.s32.totalorder %s1022_s24, %s1018_s15 }
  0x3b   : > { %789 = vmatmul.msk.bf16.vlgmr.msra.gmra.mxu3 %vm303_vm0, %v402_v26  ;;  %v435_v31 = vsel %vm433_vm7, %v432_v30, %v431_v29  ;;  %v434_v32 = vsel %vm433_vm7, %v431_v29, %v432_v30  ;;  %599 = vmatpush.bf16.msra.mxu0 %v834_v38  ;;  %v911_v29 = vld [vmem:[%s1356_s4] ss:$0 sm:$0xff]  ;;  %p1020_p4 = pnand %p1019_p1, %p1178_p3 }
  0x3c   : > { %779 = vmatmul.msk.bf16.vlgmr.msra.gmra.mxu1 %vm303_vm0, %v335_v28  ;;  %v439_v33 = vsel %vm437_vm8, %v435_v31, 0.0  ;;  %p1025_p9 = por %p1024_p2, %p1023_p11 }
  0x3d   : > { %v440_v34 = vpack.c.bf16 %v439_v33, %v434_v32  ;;  %634 = vmatpush.bf16.msra.mxu1 %v835_v42  ;;  %p1021_p8 = pneg %p1020_p4 }
  0x3f   : > { %p1026_p10 = pnand %p1025_p9, %p1021_p8 }
  0x4a   : > { %794 = vmatmul.msk.bf16.vlgmr.msrb.gmra.mxu0 %vm303_vm0, %v440_v34 }
  0xb7   : > { %v316_v39 = vpop.f32.mrf.mxu0 }
  0xb8   : > { %v324_v43 = vadd.f32 %v910_v40, %v316_v39 }
  0xb9   : > { %v357_v41 = vpop.f32.mrf.mxu1  ;;  %v386_v44 = vpop.f32.mrf.mxu2 }
  0xba   : > { %v362_v46 = vadd.f32 %v357_v41, %v324_v43 }
  0xbc   : > { %v391_v50 = vadd.f32 %v386_v44, %v362_v46 }
  0xbe   : > { %v424_v47 = vpop.f32.mrf.mxu3 }
  0xbf   : > { %v318_v45 = vpop.f32.mrf.mxu0  ;;  %v429_v54 = vadd.f32 %v424_v47, %v391_v50 }
  0xc0   : > { %v325_v48 = vadd.f32 %v910_v40, %v318_v45 }
  0xc1   : > { %v359_v49 = vpop.f32.mrf.mxu1  ;;  %v388_v52 = vpop.f32.mrf.mxu2 }
  0xc2   : > { %v363_v51 = vadd.f32 %v359_v49, %v325_v48 }
  0xc4   : > { %v392_v55 = vadd.f32 %v388_v52, %v363_v51 }
  0xc6   : > { %v426_v56 = vpop.f32.mrf.mxu3 }
  0xc7   : > { %v462_v53 = vpop.f32.mrf.mxu0  ;;  %v430_v58 = vadd.f32 %v426_v56, %v392_v55 }
  0xc8   : > { %v467_v57 = vadd.f32 %v462_v53, %v429_v54 }
  0xca   : > { %v469_v59 = vmax.f32 %v467_v57, 0.0 }
  0xcc   : > { %v573_v63 = vrot.slane %v469_v59, 1  ;;  %v472_v4 = vrot.slane %v469_v59, 6  ;;  %v509_v6 = vrot.slane %v469_v59, 7  ;;  %v608_v23 = vrot.slane %v469_v59, 2 }
  0xcf   : > { %v464_v60 = vpop.f32.mrf.mxu0 }
  0xd0   : > { %v468_v61 = vadd.f32 %v464_v60, %v430_v58 }
  0xd2   : > { %v470_v62 = vmax.f32 %v468_v61, 0.0 }
  0xd4   : > { %v574_v0 = vrot.slane %v470_v62, 1  ;;  %v544_v3 = vpack.c.bf16 %v470_v62, %v469_v59  ;;  %v473_v5 = vrot.slane %v470_v62, 6  ;;  %v510_v9 = vrot.slane %v470_v62, 7 }
  0xd5   : > { %v609_v22 = vrot.slane %v470_v62, 2 }
  0xd6   : > { %809 = vmatmul.msk.bf16.vlgmr.msrb.gmra.mxu3 %vm303_vm0, %v544_v3  ;;  %v474_v10 = vsel %vm287_vm1, %v472_v4, %v473_v5  ;;  %v475_v11 = vsel %vm287_vm1, %v473_v5, %v472_v4  ;;  %v575_v12 = vsel %vm395_vm3, %v573_v63, %v574_v0  ;;  %v576_v13 = vsel %vm395_vm3, %v574_v0, %v573_v63 }
  0xd7   : > { %v476_v14 = vsel %vm290_vm2, %v475_v11, 0.0  ;;  %v511_v15 = vsel %vm328_vm4, %v509_v6, %v510_v9  ;;  %v512_v16 = vsel %vm328_vm4, %v510_v9, %v509_v6  ;;  %v578_v17 = vsel %vm399_vm5, %v576_v13, 0.0 }
  0xd8   : > { %v478_v18 = vpack.c.bf16 %v474_v10, %v476_v14  ;;  %v513_v19 = vsel %vm331_vm6, %v512_v16, 0.0  ;;  %v579_v20 = vpack.c.bf16 %v578_v17, %v575_v12  ;;  %v611_v24 = vsel %vm433_vm7, %v609_v22, %v608_v23 }
  0xd9   : > { %v515_v21 = vpack.c.bf16 %v511_v15, %v513_v19  ;;  %v610_v25 = vsel %vm433_vm7, %v608_v23, %v609_v22  ;;  %v613_v26 = vsel %vm437_vm8, %v611_v24, 0.0 }
  0xda   : > { %799 = vmatmul.msk.bf16.vlgmr.msrb.gmra.mxu1 %vm303_vm0, %v478_v18  ;;  %814 = vmatmul.msk.bf16.vlgmr.msra.gmra.mxu0 %vm303_vm0, %v579_v20  ;;  %v614_v27 = vpack.c.bf16 %v613_v26, %v610_v25 }
  0xdb   : > { %804 = vmatmul.msk.bf16.vlgmr.msrb.gmra.mxu2 %vm303_vm0, %v515_v21 }
  0xea   : > { %819 = vmatmul.msk.bf16.vlgmr.msra.gmra.mxu1 %vm303_vm0, %v614_v27 }
 0x157   : > { %v499_v28 = vpop.f32.mrf.mxu1  ;;  %v601_v35 = vpop.f32.mrf.mxu0 }
 0x158   : > { %v507_v30 = vadd.f32 %v911_v29, %v499_v28 }
 0x159   : > { %v566_v32 = vpop.f32.mrf.mxu3 }
 0x15e   : > { %v537_v31 = vpop.f32.mrf.mxu2 }
 0x15f   : > { %v542_v33 = vadd.f32 %v537_v31, %v507_v30  ;;  %v501_v34 = vpop.f32.mrf.mxu1  ;;  %v603_v45 = vpop.f32.mrf.mxu0 }
 0x160   : > { %v508_v36 = vadd.f32 %v911_v29, %v501_v34 }
 0x161   : > { %v571_v1 = vadd.f32 %v566_v32, %v542_v33  ;;  %v568_v41 = vpop.f32.mrf.mxu3 }
 0x163   : > { %v606_v37 = vadd.f32 %v601_v35, %v571_v1 }
 0x166   : > { %v539_v2 = vpop.f32.mrf.mxu2 }
 0x167   : > { %v543_v38 = vadd.f32 %v539_v2, %v508_v36  ;;  %v636_v39 = vpop.f32.mrf.mxu1 }
 0x168   : > { %v641_v40 = vadd.f32 %v636_v39, %v606_v37 }
 0x169   : > { %v572_v42 = vadd.f32 %v568_v41, %v543_v38 }
 0x16a   : > { %v643_v43 = vadd.f32 %v641_v40, %v1228_v7 }
 0x16b   : > { %v607_v46 = vadd.f32 %v603_v45, %v572_v42 }
 0x16c   : > { %v645_v44 = vmax.f32 %v643_v43, 0.0 }
 0x16e   : > { %647 = vst.msk [vmem:[%s277_s30] sm:$0xff] %vm303_vm0, %v645_v44 }
 0x16f   : > { %v638_v47 = vpop.f32.mrf.mxu1 }
 0x170   : > { %v642_v48 = vadd.f32 %v638_v47, %v607_v46 }
 0x172   : > { %v644_v7 = vadd.f32 %v642_v48, %v1230_v8 }
 0x174   : > { %v646_v49 = vmax.f32 %v644_v7, 0.0 }
 0x176   : > { %648 = vst.msk [vmem:[%s277_s30 + $0x8] sm:$0xff] %vm303_vm0, %v646_v49 }
 0x177   : > { %1029 = shalt.err (!%p1026_p10)
}
 0x178   : > { %s1080_s8 = smov 128   ;;  %s1081_s10 = smov 8  }
 0x179   : > { %847 = dma.vmem_to_hbm [thread:$0]  (%p1178_p3), %s663_s6, 256, %s665_s26, %s650_s22, %s1080_s8, %s1080_s8, %s1081_s10  }
 0x17a PF: > { %s679_s11 = sand.u32 1, %s1060_s18   ;;  %p1363_p12 = scmp.ge.s32.totalorder %s1072_s21, 2 }
 0x17b   : > { %s680_s12 = scalar_lea.sflag [#allocation4], %s679_s11 }
 0x17c   : > { %p861_p13 = pnand %p1363_p12, %p1147_p6 }
 0x17e   : > { %p862_p0 = pneg %p861_p13 }
 0x180   : > { %1055 = dma.done.wait (%p862_p0), %s680_s12, 256  }
 0x181   : > { %1057 = vsyncadd (%p862_p0), %s680_s12, 4294967040  ;;  %p19_p5 = scmp.ge.s32.totalorder %s1168_s14, 4   ;;  %s1364_s18 = smov %s1064_s19 }
 0x182   : > { %s1365_s19 = smov %s1068_s20  ;;  %s1366_s20 = smov %s1184_s23 }
 0x183   : > { %s1367_s21 = smov %s1168_s14  ;;  %21 = sbr.rel (!%p19_p5) target bundleno = 6 (0x6), region = 101 }
 0x188   :  { %686 = vsyncpa [#allocation3], 1 }
 0x189   :  { %688 = vsyncpa [#allocation3 + $0x1], 1 }
 0x18a   :  { %689 = vsyncpa [#allocation6], 1 }
 0x18b   :  { %690 = vsyncpa [#allocation4], 1 }
 0x18c   :  { %692 = vsyncpa [#allocation4 + $0x1], 1 }

</bundles_post_ra>
